<compile_context>
chip_gen: v7x
topology: tpu7x:2x2x1
jax: 0.10.0
libtpu: 0.0.40
codegen_flags: <defaults>
</compile_context>

<pallas_src>
import jax
import jax.numpy as jnp
from jax import lax
from jax.experimental import pallas as pl
from jax.experimental.pallas import tpu as pltpu

LN_EPS = 1e-12

_TM_CANDIDATES = (2048, 1024, 512, 256, 128, 64, 32, 16, 8)
_TK_CANDIDATES = (2048, 1024, 512, 256, 128)


# --------------------------------------------------------------------------- #
# Kernels
# --------------------------------------------------------------------------- #
def _ln_epilogue(acc_f32, posb_ref, g_ref, b_ref, o_ref):
    """LayerNorm over the hidden dim (biased variance, torch.nn.LayerNorm)."""
    emb = acc_f32 + posb_ref[...].astype(jnp.float32)      # + (bias + pos)
    mean = jnp.mean(emb, axis=-1, keepdims=True)
    centered = emb - mean
    var = jnp.mean(centered * centered, axis=-1, keepdims=True)
    normed = centered * lax.rsqrt(var + LN_EPS)
    out = normed * g_ref[...] + b_ref[...]
    # dropout: inference mode -> identity
    o_ref[...] = out.astype(o_ref.dtype)


def _tf_embeddings_kernel_f32(x_ref, w_ref, posb_ref, g_ref, b_ref, o_ref):
    """f32-output variant: accumulate the matmul directly in o_ref (no scratch)."""
    k = pl.program_id(1)

    @pl.when(k == 0)
    def _():
        o_ref[...] = jnp.zeros_like(o_ref)

    o_ref[...] += jnp.dot(x_ref[...], w_ref[...],
                          preferred_element_type=jnp.float32)

    @pl.when(k == pl.num_programs(1) - 1)
    def _():
        _ln_epilogue(o_ref[...], posb_ref, g_ref, b_ref, o_ref)


def _tf_embeddings_kernel_acc(x_ref, w_ref, posb_ref, g_ref, b_ref, o_ref,
                              acc_ref):
    """Generic-output variant: f32 VMEM accumulator, cast on the last k step."""
    k = pl.program_id(1)

    @pl.when(k == 0)
    def _():
        acc_ref[...] = jnp.zeros_like(acc_ref)

    acc_ref[...] += jnp.dot(x_ref[...], w_ref[...],
                            preferred_element_type=jnp.float32)

    @pl.when(k == pl.num_programs(1) - 1)
    def _():
        _ln_epilogue(acc_ref[...], posb_ref, g_ref, b_ref, o_ref)


# --------------------------------------------------------------------------- #
# Tiling / VMEM budgeting
# --------------------------------------------------------------------------- #
def _round_up(x, m):
    return ((x + m - 1) // m) * m


def _vmem_capacity_bytes():
    """Physical VMEM of the current chip; conservative (v7x) fallback."""
    try:
        return int(pltpu.get_tpu_info().vmem_capacity_bytes)
    except Exception:
        return 64 << 20   # v7x per-TC; safe lower bound for v5e/v6e too


def _vmem_bytes(tm, tk, H, out_bytes, use_scratch):
    """Estimated kernel VMEM footprint (double-buffered inputs + output)."""
    b = 2 * tm * tk * 2            # x tile, bf16
    b += 2 * tk * H * 2            # W^T tile, bf16
    b += 2 * tm * H * 2            # pos + bias tile, bf16
    b += 2 * tm * H * out_bytes    # output tile
    b += 4 * H * 4                 # gamma + beta
    if use_scratch:
        b += tm * H * 4            # f32 accumulator
    return b


def _choose_tiles(M, V, H, out_bytes, budget, use_scratch):
    # tm: largest candidate that fits the budget (at the minimum tk) while
    # keeping >= 2 M blocks (v7x megacore) whenever M allows.
    tm = 8
    for cand in _TM_CANDIDATES:
        if cand < max(M, 9) and _vmem_bytes(cand, 128, H, out_bytes,
                                            use_scratch) <= budget:
            tm = cand
            break

    # tk: prefer the whole 128-padded vocab (single k step, weight resident),
    # otherwise the largest standard tile that fits the budget.
    v_pad128 = _round_up(V, 128)
    tk = 128
    for cand in (v_pad128,) + tuple(c for c in _TK_CANDIDATES if c < v_pad128):
        if _vmem_bytes(tm, cand, H, out_bytes, use_scratch) <= budget:
            tk = cand
            break
    return tm, tk


# --------------------------------------------------------------------------- #
# Wrapper
# --------------------------------------------------------------------------- #
def tf_embeddings(input_embeddings, w, b, pos_emb_table, gamma, beta,
                  *, compute_dtype=jnp.bfloat16):
    """
    input_embeddings: (B, S, V) float
    w:  (H, V)   nn.Linear weight (out_features, in_features)
    b:  (H,)     nn.Linear bias
    pos_emb_table: (max_position_embeddings, H)
    gamma, beta:   (H,) LayerNorm weight / bias
    returns (B, S, H) in input_embeddings.dtype
    """
    B, S, V = input_embeddings.shape
    H = w.shape[0]
    assert pos_emb_table.shape[0] >= S, (
        "position table shorter than sequence length")

    M = B * S
    out_dtype = input_embeddings.dtype
    out_bytes = jnp.dtype(out_dtype).itemsize
    use_scratch = out_dtype != jnp.float32

    capacity = _vmem_capacity_bytes()
    budget = int(capacity * 0.70)          # tile-selection budget (headroom)
    tm, tk = _choose_tiles(M, V, H, out_bytes, budget, use_scratch)

    m_pad = _round_up(M, tm)
    v_pad = _round_up(V, tk)
    n_m = m_pad // tm
    n_k = v_pad // tk

    # ---- operands --------------------------------------------------------- #
    # Matmul operands in bf16 (MXU accumulates in f32); zero-pad to tiles.
    x2 = input_embeddings.reshape(M, V).astype(compute_dtype)
    x2 = jnp.pad(x2, ((0, m_pad - M), (0, v_pad - V)))

    w_t = jnp.asarray(w).astype(compute_dtype).T                 # (V, H) once
    w_t = jnp.pad(w_t, ((0, v_pad - V), (0, 0)))

    # Fused (pos emb + linear bias), broadcast to all M rows, stored bf16.
    posb = (jnp.asarray(pos_emb_table)[:S].astype(jnp.float32)
            + jnp.asarray(b).astype(jnp.float32)[None, :])        # (S, H)
    posb = jnp.broadcast_to(posb[None], (B, S, H)).reshape(M, H)
    posb = jnp.pad(posb.astype(compute_dtype), ((0, m_pad - M), (0, 0)))

    g2 = jnp.asarray(gamma).reshape(1, H).astype(jnp.float32)
    beta2 = jnp.asarray(beta).reshape(1, H).astype(jnp.float32)

    kernel = _tf_embeddings_kernel_acc if use_scratch else _tf_embeddings_kernel_f32
    scratch = [pltpu.VMEM((tm, H), jnp.float32)] if use_scratch else []

    grid_spec = pltpu.PrefetchScalarGridSpec(
        num_scalar_prefetch=0,
        grid=(n_m, n_k),   # (M tiles: parallel, V tiles: reduction, innermost)
        in_specs=[
            pl.BlockSpec((tm, tk), lambda i, k: (i, k)),   # x tile
            pl.BlockSpec((tk, H), lambda i, k: (k, 0)),    # W^T tile (streamed over V)
            pl.BlockSpec((tm, H), lambda i, k: (i, 0)),    # pos + bias (bf16)
            pl.BlockSpec((1, H), lambda i, k: (0, 0)),     # gamma (resident)
            pl.BlockSpec((1, H), lambda i, k: (0, 0)),     # beta (resident)
        ],
        out_specs=pl.BlockSpec((tm, H), lambda i, k: (i, 0)),   # resident over V
        scratch_shapes=scratch,
    )

    out2 = pl.pallas_call(
        kernel,
        out_shape=jax.ShapeDtypeStruct((m_pad, H), out_dtype),
        grid_spec=grid_spec,
        compiler_params=pltpu.CompilerParams(
            dimension_semantics=("parallel", "arbitrary"),
            vmem_limit_bytes=int(capacity * 0.85),
        ),
    )(x2, w_t, posb, g2, beta2)

    return out2[:M].reshape(B, S, H)


# --------------------------------------------------------------------------- #
# Pure-JAX reference
# --------------------------------------------------------------------------- #
def tf_embeddings_ref(input_embeddings, w, b, pos_emb_table, gamma, beta):
    B, S, V = input_embeddings.shape
    words = jnp.einsum("bsv,hv->bsh", input_embeddings, w) + b
    pos = pos_emb_table[:S][None, :, :]
    emb = words + pos
    mean = jnp.mean(emb, axis=-1, keepdims=True)
    var = jnp.mean((emb - mean) ** 2, axis=-1, keepdims=True)
    normed = (emb - mean) / jnp.sqrt(var + LN_EPS)
    return normed * gamma + beta


# --------------------------------------------------------------------------- #
# Self-check
# --------------------------------------------------------------------------- #
def _run_case(B, S, vocab, hidden, max_pos, seed):
    key = jax.random.PRNGKey(seed)
    k_x, k_w, k_b, k_pos, k_g, k_be = jax.random.split(key, 6)

    x = jax.random.normal(k_x, (B, S, vocab), dtype=jnp.float32)
    w = jax.random.normal(k_w, (hidden, vocab), dtype=jnp.float32) * 0.02
    b = jax.random.normal(k_b, (hidden,), dtype=jnp.float32) * 0.02
    pos_table = jax.random.normal(k_pos, (max_pos, hidden), dtype=jnp.float32) * 0.02
    gamma = 1.0 + 0.1 * jax.random.normal(k_g, (hidden,), dtype=jnp.float32)
    beta = 0.1 * jax.random.normal(k_be, (hidden,), dtype=jnp.float32)

    out = tf_embeddings(x, w, b, pos_table, gamma, beta)
    out = jax.block_until_ready(out)
    ref = tf_embeddings_ref(x, w, b, pos_table, gamma, beta)

    assert out.shape == (B, S, hidden), f"bad shape {out.shape}"
    err = float(jnp.max(jnp.abs(out - ref)))
    # bf16 matmul operands (f32 accumulate) -> loosened tolerance vs f32 ref
    assert err < 7.5e-2, f"mismatch vs reference (max abs err = {err})"


if __name__ == "__main__":
    # Case 1: aligned shapes (exercises the 2-block M axis, single k step).
    _run_case(B=2, S=16, vocab=512, hidden=128, max_pos=32, seed=0)
    # Case 2: unaligned S and vocab (exercises M / V zero-padding paths).
    _run_case(B=2, S=13, vocab=460, hidden=128, max_pos=32, seed=1)

    print("KERNEL_OK")
</pallas_src>

<mosaic_0001>
module attributes {stable_mosaic.version = 11 : i64} {
  func.func @_tf_embeddings_kernel_f32(%arg0: i32, %arg1: i32, %arg2: memref<16x512xbf16, #tpu.memory_space<vmem>>, %arg3: memref<512x128xbf16, #tpu.memory_space<vmem>>, %arg4: memref<16x128xbf16, #tpu.memory_space<vmem>>, %arg5: memref<1x128xf32, #tpu.memory_space<vmem>>, %arg6: memref<1x128xf32, #tpu.memory_space<vmem>>, %arg7: memref<16x128xf32, #tpu.memory_space<vmem>>) attributes {dimension_semantics = [#tpu.dimension_semantics<parallel>, #tpu.dimension_semantics<arbitrary>], iteration_bounds = array<i64: 2, 1>, scalar_prefetch = 0 : i64, scratch_operands = 0 : i64, tpu.core_type = #tpu.core_type<tc>, window_params = [{transform_indices = @transform_0, window_bounds = array<i64: 16, 512>}, {transform_indices = @transform_1, window_bounds = array<i64: 512, 128>}, {transform_indices = @transform_2, window_bounds = array<i64: 16, 128>}, {pipeline_mode = #tpu.pipeline_mode<synchronous>, transform_indices = @transform_3, window_bounds = array<i64: 1, 128>}, {pipeline_mode = #tpu.pipeline_mode<synchronous>, transform_indices = @transform_4, window_bounds = array<i64: 1, 128>}, {transform_indices = @transform_5, window_bounds = array<i64: 16, 128>}]} {
    %c0_i32 = arith.constant 0 : i32
    %0 = arith.cmpi eq, %arg1, %c0_i32 : i32
    %1 = arith.extui %0 : i1 to i32
    %c0_i32_0 = arith.constant 0 : i32
    %2 = arith.cmpi ne, %1, %c0_i32_0 : i32
    scf.if %2 {
      %cst_10 = arith.constant 0.000000e+00 : f32
      %12 = vector.broadcast %cst_10 : f32 to vector<16x128xf32>
      %c0_11 = arith.constant 0 : index
      %c0_12 = arith.constant 0 : index
      %13 = vector.load %arg7[%c0_11, %c0_12] : memref<16x128xf32, #tpu.memory_space<vmem>>, vector<16x128xf32>
      tpu.vector_store %arg7[%c0_11, %c0_12], %12 {strides = array<i32>} : memref<16x128xf32, #tpu.memory_space<vmem>>, vector<16x128xf32>,
    } else {
    }
    %c0 = arith.constant 0 : index
    %c0_1 = arith.constant 0 : index
    %3 = vector.load %arg7[%c0, %c0_1] : memref<16x128xf32, #tpu.memory_space<vmem>>, vector<16x128xf32>
    %c0_2 = arith.constant 0 : index
    %c0_3 = arith.constant 0 : index
    %4 = vector.load %arg2[%c0_2, %c0_3] : memref<16x512xbf16, #tpu.memory_space<vmem>>, vector<16x512xbf16>
    %c0_4 = arith.constant 0 : index
    %c0_5 = arith.constant 0 : index
    %5 = vector.load %arg3[%c0_4, %c0_5] : memref<512x128xbf16, #tpu.memory_space<vmem>>, vector<512x128xbf16>
    %cst = arith.constant dense<0.000000e+00> : vector<16x128xf32>
    %6 = tpu.matmul %4, %5, %cst {dimension_numbers = #tpu.dot_dimension_numbers<[1], [0], [0], [1], [0, 0, 1, 1], [], []>} : vector<16x512xbf16>, vector<512x128xbf16>, vector<16x128xf32> -> vector<16x128xf32>
    %7 = arith.addf %3, %6 : vector<16x128xf32>
    %c0_6 = arith.constant 0 : index
    %c0_7 = arith.constant 0 : index
    %8 = vector.load %arg7[%c0_6, %c0_7] : memref<16x128xf32, #tpu.memory_space<vmem>>, vector<16x128xf32>
    tpu.vector_store %arg7[%c0_6, %c0_7], %7 {strides = array<i32>} : memref<16x128xf32, #tpu.memory_space<vmem>>, vector<16x128xf32>,
    %c0_i32_8 = arith.constant 0 : i32
    %9 = arith.cmpi eq, %arg1, %c0_i32_8 : i32
    %10 = arith.extui %9 : i1 to i32
    %c0_i32_9 = arith.constant 0 : i32
    %11 = arith.cmpi ne, %10, %c0_i32_9 : i32
    scf.if %11 {
      %c0_10 = arith.constant 0 : index
      %c0_11 = arith.constant 0 : index
      %12 = vector.load %arg7[%c0_10, %c0_11] : memref<16x128xf32, #tpu.memory_space<vmem>>, vector<16x128xf32>
      %c0_12 = arith.constant 0 : index
      %c0_13 = arith.constant 0 : index
      %13 = vector.load %arg4[%c0_12, %c0_13] : memref<16x128xbf16, #tpu.memory_space<vmem>>, vector<16x128xbf16>
      %14 = arith.extf %13 : vector<16x128xbf16> to vector<16x128xf32>
      %15 = arith.addf %12, %14 : vector<16x128xf32>
      %cst_14 = arith.constant dense<0.000000e+00> : vector<16xf32>
      %16 = vector.multi_reduction <add>, %15, %cst_14 [1] : vector<16x128xf32> to vector<16xf32>
      %17 = vector.shape_cast %16 : vector<16xf32> to vector<16x1xf32>
      %cst_15 = arith.constant 1.280000e+02 : f32
      %18 = vector.broadcast %cst_15 : f32 to vector<16x1xf32>
      %19 = arith.divf %17, %18 : vector<16x1xf32>
      %20 = vector.broadcast %19 : vector<16x1xf32> to vector<16x128xf32>
      %21 = arith.subf %15, %20 : vector<16x128xf32>
      %22 = arith.mulf %21, %21 : vector<16x128xf32>
      %cst_16 = arith.constant dense<0.000000e+00> : vector<16xf32>
      %23 = vector.multi_reduction <add>, %22, %cst_16 [1] : vector<16x128xf32> to vector<16xf32>
      %24 = vector.shape_cast %23 : vector<16xf32> to vector<16x1xf32>
      %cst_17 = arith.constant 1.280000e+02 : f32
      %25 = vector.broadcast %cst_17 : f32 to vector<16x1xf32>
      %26 = arith.divf %24, %25 : vector<16x1xf32>
      %cst_18 = arith.constant 9.99999996E-13 : f32
      %27 = vector.broadcast %cst_18 : f32 to vector<16x1xf32>
      %28 = arith.addf %26, %27 : vector<16x1xf32>
      %29 = math.rsqrt %28 : vector<16x1xf32>
      %30 = vector.broadcast %29 : vector<16x1xf32> to vector<16x128xf32>
      %31 = arith.mulf %21, %30 : vector<16x128xf32>
      %c0_19 = arith.constant 0 : index
      %c0_20 = arith.constant 0 : index
      %32 = vector.load %arg5[%c0_19, %c0_20] : memref<1x128xf32, #tpu.memory_space<vmem>>, vector<1x128xf32>
      %33 = vector.broadcast %32 : vector<1x128xf32> to vector<16x128xf32>
      %34 = arith.mulf %31, %33 : vector<16x128xf32>
      %c0_21 = arith.constant 0 : index
      %c0_22 = arith.constant 0 : index
      %35 = vector.load %arg6[%c0_21, %c0_22] : memref<1x128xf32, #tpu.memory_space<vmem>>, vector<1x128xf32>
      %36 = vector.broadcast %35 : vector<1x128xf32> to vector<16x128xf32>
      %37 = arith.addf %34, %36 : vector<16x128xf32>
      %c0_23 = arith.constant 0 : index
      %c0_24 = arith.constant 0 : index
      %38 = vector.load %arg7[%c0_23, %c0_24] : memref<16x128xf32, #tpu.memory_space<vmem>>, vector<16x128xf32>
      tpu.vector_store %arg7[%c0_23, %c0_24], %37 {strides = array<i32>} : memref<16x128xf32, #tpu.memory_space<vmem>>, vector<16x128xf32>,
    } else {
    }
    return
  }
  func.func @transform_0(%arg0: i32, %arg1: i32) -> (i32, i32) {
    %c0_i32 = arith.constant 0 : i32
    return %arg0, %arg1 : i32, i32
  }
  func.func @transform_1(%arg0: i32, %arg1: i32) -> (i32, i32) {
    %c0_i32 = arith.constant 0 : i32
    %c0_i32_0 = arith.constant 0 : i32
    return %arg1, %c0_i32 : i32, i32
  }
  func.func @transform_2(%arg0: i32, %arg1: i32) -> (i32, i32) {
    %c0_i32 = arith.constant 0 : i32
    %c0_i32_0 = arith.constant 0 : i32
    return %arg0, %c0_i32 : i32, i32
  }
  func.func @transform_3(%arg0: i32, %arg1: i32) -> (i32, i32) {
    %c0_i32 = arith.constant 0 : i32
    %c0_i32_0 = arith.constant 0 : i32
    %c0_i32_1 = arith.constant 0 : i32
    return %c0_i32, %c0_i32_0 : i32, i32
  }
  func.func @transform_4(%arg0: i32, %arg1: i32) -> (i32, i32) {
    %c0_i32 = arith.constant 0 : i32
    %c0_i32_0 = arith.constant 0 : i32
    %c0_i32_1 = arith.constant 0 : i32
    return %c0_i32, %c0_i32_0 : i32, i32
  }
  func.func @transform_5(%arg0: i32, %arg1: i32) -> (i32, i32) {
    %c0_i32 = arith.constant 0 : i32
    %c0_i32_0 = arith.constant 0 : i32
    return %arg0, %c0_i32 : i32, i32
  }
}

</mosaic_0001>

<bundles_post_ra>
// kernel: tpu_custom_call.1
= control target key start
LH: loop header
LB: loop body
LE: loop exit
PB: predicated region body
PF: predicated region fallthrough
CT: control target
= control target key end

     0   :  { %s1620_s0 = inlined_call_operand.hbm [shape: bf16[32,512], index: 0, kind: input, shape index: {}]   ;;  %s1621_s1 = inlined_call_operand.hbm [shape: bf16[512,128], index: 1, kind: input, shape index: {}]   ;;  %s1622_s2 = inlined_call_operand.hbm [shape: bf16[32,128], index: 2, kind: input, shape index: {}]   ;;  %s1623_s3 = inlined_call_operand.vmem [shape: f32[1,128], index: 3, kind: input, shape index: {}]   ;;  %s1624_s4 = inlined_call_operand.vmem [shape: f32[1,128], index: 4, kind: input, shape index: {}]   ;;  %s1625_s5 = inlined_call_operand.hbm [shape: f32[32,128], index: 5, kind: output, shape index: {}]  }
   0x1   :  { %1632 = sst [smem:[#allocation15_spill]] %s1620_s0 }
   0x2   :  { %1633 = sst [smem:[#allocation16_spill]] %s1622_s2 }
   0x3   :  { %10 = vsyncpa [#allocation3], 0 }
   0x4   :  { %12 = vsyncpa [#allocation3 + $0x1], 0 }
   0x5   :  { %13 = vsyncpa [#allocation6], 0 }
   0x6   :  { %14 = vsyncpa [#allocation4], 0 }
   0x7   :  { %16 = vsyncpa [#allocation4 + $0x1], 0  ;;  %s1343_s18 = smov 0   ;;  %s1345_s19 = smov 0  }
   0x8   :  { %s1347_s20 = smov 0   ;;  %s1349_s21 = smov 0  }
   0x9   :  { %s1351_s22 = smov 0   ;;  %s1353_s23 = smov 0  }
   0xa LB: > { %1634 = sst [smem:[#allocation13_spill]] %s1297_s22  ;;  %s34_s24 = sadd.s32 1, %s1297_s22  ;;  %s1301_s23 = sphi %s1353_s23, %s22_s23   ;;  %s1297_s22 = sphi %s1351_s22, %s1652_s22   ;;  %s1293_s21 = sphi %s1349_s21, %s1651_s21   ;;  %s1289_s20 = sphi %s1347_s20, %s1655_s20   ;;  %s1285_s19 = sphi %s1345_s19, %s1654_s19   ;;  %s1281_s18 = sphi %s1343_s18, %s1653_s18  }
   0xb   : > { %s43_s25 = sadd.s32 1, %s1289_s20  ;;  %p36_p0 = scmp.ge.s32.totalorder %s34_s24, 2 }
   0xc   : > { %p50_p1 = scmp.ne.s32.totalorder %s1289_s20, %s1285_s19  ;;  %p51_p2 = scmp.eq.s32.totalorder %s1301_s23, 0 }
   0xd   : > { %s1657_s24 = smov (%p36_p0, %s34_s24), 0  ;;  %p1022_p5 = scmp.lt.s32.totalorder %s1301_s23, 2 }
   0xe   : > { %1635 = sst [smem:[#allocation14_spill]] %s1657_s24  ;;  %p52_p4 = por %p51_p2, %p50_p1 }
   0xf   : > { %s38_s26 = ssub.s32 %s1297_s22, %s1657_s24  ;;  %s222_s27 = sand.u32 1, %s1301_s23  }
  0x10   : > { %p41_p6 = scmp.eq.s32.totalorder %s38_s26, 0  ;;  %s224_s28 = sand.u32 1, %s1289_s20  }
  0x11   : > { %s945_s29 = sshll.u32 %s1297_s22, 9  ;;  %s889_s6 = sshll.u32 %s224_s28, 5 }
  0x12   : > { %s1391_s30 = scalar_select %p41_p6, %s1289_s20, %s43_s25  }
  0x13   : > { %s1636_s0 = sld [smem:[#allocation15_spill]]  ;;  %p1398_p7 = pnand %p1022_p5, %p52_p4 }
  0x14   : > { %s226_s11 = scalar_lea.vmem [#allocation2], %s889_s6  ;;  %s1404_s13 = sshll.u32 %s224_s28, 3 }
  0x15   : > { %s236_s12 = sshll.u32 %s226_s11, 4  ;;  %s1406_s14 = scalar_lea.sflag [#allocation3], %s222_s27  ;;  %s1402_s12 = int_to_ptr.vmem [resolvable:$true] %s236_s12 }
  0x16   : > { %p1125_p9 = pneg %p1398_p7 }
  0x19   : > { %s1396_s9 = scalar_lea.hbm %s1636_s0, %s945_s29  ;;  %s1128_s25 = scalar_lea.hbm %s1636_s0, 1024 }
  0x1a   : > { %s1123_s15 = scalar_lea.hbm %s1396_s9, 512  ;;  %p1129_p12 = scmp.lt.u32.totalorder %s1396_s9, %s1636_s0 }
  0x1b   : > { %p1124_p8 = scmp.ne.s32.totalorder %s1396_s9, %s1123_s15  ;;  %p1130_p13 = scmp.lt.u32.totalorder %s1128_s25, %s1123_s15 }
  0x1c   : > { %p1132_p2 = scmp.lt.u32.totalorder %s1123_s15, %s1396_s9 }
  0x1d   : > { %p1126_p10 = pnand %p1125_p9, %p1124_p8  ;;  %p1131_p0 = por %p1130_p13, %p1129_p12 }
  0x1f   : > { %p1127_p11 = pneg %p1126_p10  ;;  %p1133_p4 = por %p1132_p2, %p1131_p0 }
  0x21   : > { %p1134_p5 = pnand %p1133_p4, %p1127_p11 }
  0x23   : > { %1137 = shalt.err (!%p1134_p5)
}
  0x24   : > { %s1138_s27 = scalar_lea.vmem %s1402_s12, 512  ;;  %s1303_s28 = smov [#allocation2]  }
  0x25   : > { %p1139_p6 = scmp.ne.s32.totalorder %s1402_s12, %s1138_s27  ;;  %s1143_s6 = sshll.u32 %s1303_s28, 4  ;;  %s1144_s6 = int_to_ptr.vmem [resolvable:$false] %s1143_s6 }
  0x26   : > { %s1145_s7 = scalar_lea.vmem %s1144_s6, 1024  ;;  %p1146_p3 = scmp.lt.s32.totalorder %s1402_s12, %s1144_s6 }
  0x27   : > { %p1141_p8 = pnand %p1139_p6, %p1125_p9  ;;  %p1147_p12 = scmp.lt.s32.totalorder %s1145_s7, %s1138_s27 }
  0x29   : > { %p1142_p10 = pneg %p1141_p8  ;;  %p1148_p13 = por %p1147_p12, %p1146_p3 }
  0x2b   : > { %p1149_p0 = pnand %p1148_p13, %p1142_p10 }
  0x2d   : > { %1152 = shalt.err (!%p1149_p0)
}
  0x2e   : > { %s1304_s8 = smov 256   ;;  %s1305_s11 = smov 16  }
  0x2f   : > { %1013 = dma.hbm_to_vmem [thread:$0]  (!%p1398_p7), %s1396_s9, 512, %s1402_s12, %s1406_s14, %s1304_s8, %s1304_s8, %s1305_s11  }
  0x30   : > { %s1435_s15 = sadd.s32 4294967295, %s1301_s23   ;;  %s885_s16 = sadd.s32 4294967294, %s1301_s23  }
  0x31   : > { %p56_p3 = scmp.ne.s32.totalorder %s1285_s19, %s1281_s18  ;;  %p1626_p11 = scmp.eq.s32.totalorder %s1435_s15, 0 }
  0x32   : > { %p174_p2 = scmp.eq.s32.totalorder %s1435_s15, 1  ;;  %p180_p4 = scmp.eq.s32.totalorder %s885_s16, 1 }
  0x33   : > { %p1444_p5 = por %p1626_p11, %p56_p3  ;;  %p886_p6 = scmp.ge.s32.totalorder %s1301_s23, 1 }
  0x34   : > { %p1452_p8 = por %p174_p2, %p50_p1  ;;  %p1456_p10 = por %p180_p4, %p56_p3 }
  0x35   : > { %s1638_s17 = scalar_select %p1444_p5, 1, 0 }
  0x36   : > { %s1639_s9 = scalar_select %p1452_p8, 1, 0 }
  0x37   : > { %s1640_s12 = scalar_select %p1456_p10, 1, 0 }
  0x38   : > { %p187_p12 = scmp.lt.s32.totalorder %s1301_s23, 3  ;;  %s250_s25 = scalar_lea.vmem [#allocation7], %s1404_s13 }
  0x39   : > { %s257_s26 = sshll.u32 %s250_s25, 4  ;;  %s1306_s27 = smov [#allocation5]   ;;  %s1474_s26 = int_to_ptr.vmem [resolvable:$true] %s257_s26 }
  0x3a   : > { %p1462_p13 = pnand %p886_p6, %p187_p12  ;;  %s202_s28 = sshll.u32 %s1306_s27, 4  ;;  %s1476_s28 = int_to_ptr.vmem [resolvable:$true] %s202_s28 }
  0x3b   : > { %s946_s6 = sshll.u32 %s1297_s22, 7  ;;  %s1642_s2 = sld [smem:[#allocation16_spill]] }
  0x3c   : > { %s1641_s29 = scalar_select %p1462_p13, 1, 0 }
  0x3d   : > { %p1006_p1 = pneg %p1462_p13 }
  0x3f   : > { %p1480_p0 = pnand %p1006_p1, %p1626_p11 }
  0x41   : > { %s1472_s11 = scalar_lea.hbm %s1642_s2, %s946_s6  ;;  %s1158_s6 = scalar_lea.hbm %s1642_s2, 256 }
  0x42   : > { %s1153_s16 = scalar_lea.hbm %s1472_s11, 128  ;;  %p1159_p6 = scmp.lt.u32.totalorder %s1472_s11, %s1642_s2 }
  0x43   : > { %p1154_p3 = scmp.ne.s32.totalorder %s1472_s11, %s1153_s16  ;;  %p1160_p12 = scmp.lt.u32.totalorder %s1158_s6, %s1153_s16 }
  0x44   : > { %p1162_p1 = scmp.lt.u32.totalorder %s1153_s16, %s1472_s11 }
  0x45   : > { %p1156_p2 = pnand %p1154_p3, %p1125_p9  ;;  %p1161_p10 = por %p1160_p12, %p1159_p6 }
  0x47   : > { %p1157_p4 = pneg %p1156_p2  ;;  %p1163_p11 = por %p1162_p1, %p1161_p10 }
  0x49   : > { %p1164_p8 = pnand %p1163_p11, %p1157_p4 }
  0x4b   : > { %1167 = shalt.err (!%p1164_p8)
}
  0x4c   : > { %s1168_s0 = scalar_lea.vmem %s1474_s26, 128  ;;  %s1307_s25 = smov [#allocation7]  }
  0x4d   : > { %p1169_p3 = scmp.ne.s32.totalorder %s1474_s26, %s1168_s0  ;;  %s1173_s27 = sshll.u32 %s1307_s25, 4  ;;  %s1174_s27 = int_to_ptr.vmem [resolvable:$false] %s1173_s27 }
  0x4e   : > { %s1175_s7 = scalar_lea.vmem %s1174_s27, 256  ;;  %p1176_p13 = scmp.lt.s32.totalorder %s1474_s26, %s1174_s27 }
  0x4f   : > { %p1171_p2 = pnand %p1169_p3, %p1125_p9  ;;  %p1177_p6 = scmp.lt.s32.totalorder %s1175_s7, %s1168_s0 }
  0x51   : > { %p1172_p5 = pneg %p1171_p2  ;;  %p1178_p12 = por %p1177_p6, %p1176_p13 }
  0x53   : > { %p1179_p10 = pnand %p1178_p12, %p1172_p5 }
  0x55   : > { %1182 = shalt.err (!%p1179_p10)
}
  0x56   : > { %s1308_s16 = smov 64   ;;  %s1309_s6 = smov 4  }
  0x57   : > { %1016 = dma.hbm_to_vmem [thread:$0]  (!%p1398_p7), %s1472_s11, 128, %s1474_s26, %s1406_s14, %s1308_s16, %s1308_s16, %s1309_s6  }
  0x58   : > { %s1183_s25 = scalar_lea.hbm %s1621_s1, 4096  ;;  %p1185_p11 = pneg %p1480_p0 }
  0x59   : > { %p1184_p9 = scmp.ne.s32.totalorder %s1621_s1, %s1183_s25  ;;  %p1190_p13 = scmp.lt.u32.totalorder %s1183_s25, %s1621_s1 }
  0x5b   : > { %p1186_p5 = pnand %p1185_p11, %p1184_p9 }
  0x5d   : > { %p1187_p8 = pneg %p1186_p5 }
  0x5f   : > { %p1192_p4 = pnand %p1190_p13, %p1187_p8 }
  0x61   : > { %1195 = shalt.err (!%p1192_p4)
}
  0x62   : > { %s1196_s10 = scalar_lea.vmem %s1476_s28, 4096  ;;  %p1204_p2 = scmp.lt.s32.totalorder %s1476_s28, %s1476_s28 }
  0x63   : > { %p1197_p7 = scmp.ne.s32.totalorder %s1476_s28, %s1196_s10  ;;  %p1205_p6 = scmp.lt.s32.totalorder %s1196_s10, %s1196_s10 }
  0x65   : > { %p1199_p1 = pnand %p1197_p7, %p1185_p11  ;;  %p1206_p12 = por %p1205_p6, %p1204_p2 }
  0x67   : > { %p1200_p3 = pneg %p1199_p1 }
  0x69   : > { %p1207_p10 = pnand %p1206_p12, %p1200_p3 }
  0x6b   : > { %1210 = shalt.err (!%p1207_p10)
}
  0x6c   : > { %1009 = dma.hbm_to_vmem [thread:$0]  (!%p1480_p0), %s1621_s1, 4096, %s1476_s28, [#allocation6], %s1308_s16, %s1308_s16, %s1309_s6  }
  0x6d   : > { %p1644_p9 = scmp.ne.s32.totalorder %s1641_s29, 0 }
  0x6e   : > { %s271_s24 = sand.u32 (!%p1644_p9), 1, %s1435_s15   ;;  %s1533_s14 = sand.u32 (!%p1644_p9), 1, %s1285_s19  }
  0x6f   : > { %269 = sbr.rel (%p1644_p9) target bundleno = 709 (0x2c5), region = 40  ;;  %s897_s26 = sshll.u32 (!%p1644_p9), %s1533_s14, 5 }
  0x70   : > { %s272_s11 = scalar_lea.sflag (!%p1644_p9), [#allocation3], %s271_s24  ;;  %s1536_s7 = scalar_lea.vmem (!%p1644_p9), [#allocation2], %s897_s26 }
  0x71   : > { %p1645_p11 = scmp.ne.s32.totalorder (!%p1644_p9), %s1638_s17, 0 }
  0x76   : > { %1264 = dma.done.wait (%p1645_p11), %s272_s11, 512  }
  0x77   : > { %1266 = vsyncadd (%p1645_p11), %s272_s11, 4294966784  ;;  %p1646_p0 = scmp.eq.s32.totalorder %s1435_s15, 0 }
  0x79   : > { %1268 = dma.done.wait (%p1646_p0), [#allocation6], 4096   ;;  %p1647_p5 = pmov %p1646_p0 }
  0x7a   : > { %s899_s29 = sshll.u32 %s1533_s14, 3 }
  0x7b   : > { %1270 = vsyncadd (%p1647_p5), [#allocation6], 4294963200  ;;  %s1547_s28 = scalar_lea.vmem [#allocation7], %s899_s29 }
  0x7c   : > { %1272 = dma.done.wait (%p1645_p11), %s272_s11, 128  }
  0x7d   : > { %1274 = vsyncadd (%p1645_p11), %s272_s11, 4294967168  ;;  %v1081_v0 = vld [vmem:[#allocation5 + $0x40] sm:$0xff]   ;;  %v1085_v4 = vld [vmem:[#allocation5 + $0x48] sm:$0xff]   ;;  %s900_s13 = sshll.u32 %s1533_s14, 4  ;;  %s947_s8 = sshll.u32 %s1293_s21, 8 }
  0x7e   : > { %v1082_v1 = vld [vmem:[#allocation5 + $0xc0] sm:$0xff]   ;;  %952 = vmatprep.subr.bf16.mxu0 %v1081_v0  ;;  %v1086_v5 = vld [vmem:[#allocation5 + $0xc8] sm:$0xff]   ;;  %v1089_v8 = vld [vmem:[#allocation5 + $0x50] sm:$0xff]   ;;  %s319_s25 = scalar_lea.vmem [#allocation8], %s900_s13  ;;  %s1569_s2 = scalar_lea.hbm %s1625_s5, %s947_s8 }
  0x7f   : > { %v1083_v2 = vld [vmem:[#allocation5] sm:$0xff]   ;;  %974 = vmatprep.subr.bf16.mxu1 %v1082_v1  ;;  %v1087_v6 = vld [vmem:[#allocation5 + $0x8] sm:$0xff]   ;;  %v1090_v9 = vld [vmem:[#allocation5 + $0xd0] sm:$0xff]   ;;  %s768_s0 = sshll.u32 %s319_s25, 4  ;;  %s755_s22 = scalar_lea.sflag [#allocation4], %s1533_s14  ;;  %s1571_s0 = int_to_ptr.vmem [resolvable:$true] %s768_s0 }
  0x80   : > { %v1084_v3 = vld [vmem:[#allocation5 + $0x80] sm:$0xff]   ;;  %953 = vmatpush3.bf16.msra.mxu0 %v1083_v2  ;;  %v1088_v7 = vld [vmem:[#allocation5 + $0x88] sm:$0xff]   ;;  %v1091_v10 = vld [vmem:[#allocation5 + $0x10] sm:$0xff]   ;;  %s1211_s24 = scalar_lea.vmem %s1571_s0, 256  ;;  %p1648_p13 = scmp.ne.s32.totalorder %s1639_s9, 0 }
  0x81   : > { %975 = vmatpush3.bf16.msra.mxu1 %v1084_v3  ;;  %954 = vmatprep.subr.bf16.mxu0 %v1085_v4  ;;  %v1092_v11 = vld [vmem:[#allocation5 + $0x90] sm:$0xff]   ;;  %v1093_v12 = vld [vmem:[#allocation5 + $0x58] sm:$0xff]   ;;  %v1097_v16 = vld [vmem:[#allocation5 + $0x60] sm:$0xff]   ;;  %p1212_p8 = scmp.ne.s32.totalorder %s1571_s0, %s1211_s24  ;;  %s1310_s21 = smov [#allocation8]  }
  0x82   : > { %976 = vmatprep.subr.bf16.mxu1 %v1086_v5  ;;  %v1094_v13 = vld [vmem:[#allocation5 + $0xd8] sm:$0xff]   ;;  %v1098_v17 = vld [vmem:[#allocation5 + $0xe0] sm:$0xff]   ;;  %v1101_v20 = vld [vmem:[#allocation5 + $0x68] sm:$0xff]   ;;  %s1215_s26 = sshll.u32 %s1310_s21, 4  ;;  %s1216_s26 = int_to_ptr.vmem [resolvable:$false] %s1215_s26 }
  0x83   : > { %v1095_v14 = vld [vmem:[#allocation5 + $0x18] sm:$0xff]   ;;  %v1099_v18 = vld [vmem:[#allocation5 + $0x20] sm:$0xff]   ;;  %v1102_v21 = vld [vmem:[#allocation5 + $0xe8] sm:$0xff]   ;;  %p1213_p4 = pnand %p1212_p8, %p1648_p13  ;;  %s1217_s11 = scalar_lea.vmem %s1216_s26, 512 }
  0x84   : > { %955 = vmatpush3.bf16.msra.mxu0 %v1087_v6  ;;  %v1096_v15 = vld [vmem:[#allocation5 + $0x98] sm:$0xff]   ;;  %v1100_v19 = vld [vmem:[#allocation5 + $0xa0] sm:$0xff]   ;;  %v1103_v22 = vld [vmem:[#allocation5 + $0x28] sm:$0xff]   ;;  %p1218_p1 = scmp.lt.s32.totalorder %s1571_s0, %s1216_s26  ;;  %p1219_p3 = scmp.lt.s32.totalorder %s1217_s11, %s1211_s24 }
  0x85   : > { %977 = vmatpush3.bf16.msra.mxu1 %v1088_v7  ;;  %956 = vmatprep.subr.bf16.mxu0 %v1089_v8  ;;  %v1104_v23 = vld [vmem:[#allocation5 + $0xa8] sm:$0xff]   ;;  %v1105_v24 = vld [vmem:[#allocation5 + $0x70] sm:$0xff]   ;;  %v1109_v28 = vld [vmem:[#allocation5 + $0x78] sm:$0xff]   ;;  %p1214_p7 = pneg %p1213_p4 }
  0x86   : > { %978 = vmatprep.subr.bf16.mxu1 %v1090_v9  ;;  %v1106_v25 = vld [vmem:[#allocation5 + $0xf0] sm:$0xff]   ;;  %v1110_v29 = vld [vmem:[#allocation5 + $0xf8] sm:$0xff]   ;;  %v949_v42 = vld [vmem:[%s1547_s28] sm:$0xff]   ;;  %p1220_p2 = por %p1219_p3, %p1218_p1 }
  0x87   : > { %v1107_v26 = vld [vmem:[#allocation5 + $0x30] sm:$0xff]   ;;  %v1111_v30 = vld [vmem:[#allocation5 + $0x38] sm:$0xff]   ;;  %v950_v50 = vunpack.c.l.bf16 %v949_v42  ;;  %v951_v53 = vunpack.c.h.bf16 %v949_v42  ;;  %v937_v6 = vld [vmem:[%s1623_s3] ss:$0 sm:$0xff] }
  0x88   : > { %957 = vmatpush3.bf16.msra.mxu0 %v1091_v10  ;;  %v1108_v27 = vld [vmem:[#allocation5 + $0xb0] sm:$0xff]   ;;  %v1112_v31 = vld [vmem:[#allocation5 + $0xb8] sm:$0xff]   ;;  %v938_v8 = vld [vmem:[%s1624_s4] ss:$0 sm:$0xff]  ;;  %p1221_p6 = pnand %p1220_p2, %p1214_p7 }
  0x89   : > { %979 = vmatpush3.bf16.msra.mxu1 %v1092_v11  ;;  %958 = vmatprep.subr.bf16.mxu0 %v1093_v12  ;;  %v1113_v32 = vld [vmem:[%s1536_s7] ss:$16 sps:$4 sm:$0xff]   ;;  %v1115_v33 = vld [vmem:[%s1536_s7 + $0x4] ss:$16 sps:$4 sm:$0xff]   ;;  %v1116_v34 = vld [vmem:[%s1536_s7 + $0x8] ss:$16 sps:$4 sm:$0xff]  }
  0x8a   : > { %980 = vmatprep.subr.bf16.mxu1 %v1094_v13  ;;  %v1118_v35 = vld [vmem:[%s1536_s7 + $0xc] ss:$16 sps:$4 sm:$0xff]   ;;  %646 = vmatprep.mubr.bf16.mxu0 %v1115_v33 }
  0x8b   : > { %687 = vmatprep.mubr.bf16.mxu1 %v1118_v35 }
  0x8c   : > { %959 = vmatpush3.bf16.msra.mxu0 %v1095_v14 }
  0x8d   : > { %981 = vmatpush3.bf16.msra.mxu1 %v1096_v15  ;;  %960 = vmatprep.subr.bf16.mxu0 %v1097_v16 }
  0x8e   : > { %982 = vmatprep.subr.bf16.mxu1 %v1098_v17 }
  0x90   : > { %961 = vmatpush3.bf16.msra.mxu0 %v1099_v18 }
  0x91   : > { %983 = vmatpush3.bf16.msra.mxu1 %v1100_v19  ;;  %962 = vmatprep.subr.bf16.mxu0 %v1101_v20 }
  0x92   : > { %984 = vmatprep.subr.bf16.mxu1 %v1102_v21 }
  0x94   : > { %963 = vmatpush3.bf16.msra.mxu0 %v1103_v22 }
  0x95   : > { %985 = vmatpush3.bf16.msra.mxu1 %v1104_v23  ;;  %964 = vmatprep.subr.bf16.mxu0 %v1105_v24 }
  0x96   : > { %986 = vmatprep.subr.bf16.mxu1 %v1106_v25 }
  0x98   : > { %965 = vmatpush3.bf16.msra.mxu0 %v1107_v26 }
  0x99   : > { %987 = vmatpush3.bf16.msra.mxu1 %v1108_v27  ;;  %966 = vmatprep.subr.bf16.mxu0 %v1109_v28 }
  0x9a   : > { %988 = vmatprep.subr.bf16.mxu1 %v1110_v29 }
  0x9c   : > { %967 = vmatpush3.bf16.msra.mxu0 %v1111_v30 }
  0x9d   : > { %989 = vmatpush3.bf16.msra.mxu1 %v1112_v31 }
  0x9f   : > { %647 = vmatmul.mubr.bf16.vlgmr.msra.gmra.mrb[0].mxu0 %v1113_v32 }
  0xa0   : > { %688 = vmatmul.mubr.bf16.vlgmr.msra.gmra.mrb[0].mxu1 %v1116_v34 }
 0x172   : > { %v968_v36 = vpop.f32.mrb[0].mxu0 }
 0x173   : > { %v990_v37 = vpop.f32.mrb[0].mxu1  ;;  %v969_v38 = vpop.f32.mrb[1].mxu0 }
 0x174   : > { %v970_v39 = vadd.f32 %v969_v38, %v968_v36  ;;  %v991_v40 = vpop.f32.mrb[1].mxu1  ;;  %v971_v41 = vpop.f32.mrb[2].mxu0 }
 0x175   : > { %v992_v43 = vadd.f32 %v991_v40, %v990_v37  ;;  %v993_v44 = vpop.f32.mrb[2].mxu1  ;;  %v972_v45 = vpop.f32.mrb[3].mxu0 }
 0x176   : > { %v973_v46 = vadd.f32 %v972_v45, %v971_v41  ;;  %v994_v47 = vpop.f32.mrb[3].mxu1 }
 0x177   : > { %v690_v48 = vadd.f32 %v992_v43, %v970_v39  ;;  %v995_v49 = vadd.f32 %v994_v47, %v993_v44 }
 0x179   : > { %v693_v51 = vadd.f32 %v995_v49, %v973_v46  ;;  %v709_v52 = vadd.f32 %v950_v50, %v690_v48 }
 0x17b   : > { %711 = vadd.xlane.f32.xlu0 %v709_v52  ;;  %v710_v54 = vadd.f32 %v951_v53, %v693_v51 }
 0x17f   : > { %713 = vadd.xlane.f32.xlu0 %v710_v54 }
 0x208   : > { %v712_v55 = vpop.xlane.xlu0 %711 }
 0x209   : > { %v716_v56 = vmul.f32 0.0078125, %v712_v55 }
 0x20b   : > { %v718_v57 = vsub.f32 %v709_v52, %v716_v56 }
 0x20c   : > { %v714_v58 = vpop.xlane.xlu0 %713 }
 0x20d   : > { %v717_v59 = vmul.f32 0.0078125, %v714_v58  ;;  %v720_v60 = vmul.f32 %v718_v57, %v718_v57 }
 0x20f   : > { %v719_v61 = vsub.f32 %v710_v54, %v717_v59  ;;  %722 = vadd.xlane.f32.xlu1 %v720_v60 }
 0x211   : > { %v721_v62 = vmul.f32 %v719_v61, %v719_v61 }
 0x213   : > { %724 = vadd.xlane.f32.xlu1 %v721_v62 }
 0x29c   : > { %v723_v63 = vpop.xlane.xlu1 %722 }
 0x29d   : > { %v726_v0 = vmul.f32 0.0078125, %v723_v63 }
 0x29f   : > { %v728_v1 = vadd.f32 1e-12, %v726_v0 }
 0x2a0   : > { %v725_v2 = vpop.xlane.xlu1 %724 }
 0x2a1   : > { %1119 = vrsqrt.f32 %v728_v1  ;;  %v727_v3 = vmul.f32 0.0078125, %v725_v2 }
 0x2a3   : > { %v729_v4 = vadd.f32 1e-12, %v727_v3 }
 0x2a5   : > { %1121 = vrsqrt.f32 %v729_v4 }
 0x2ab   : > { %v1120_v5 = vpop.eup %1119 }
 0x2ac   : > { %v732_v7 = vmul.f32 %v1120_v5, %v718_v57 }
 0x2ae   : > { %v741_v9 = vmul.f32 %v937_v6, %v732_v7 }
 0x2af   : > { %v1122_v10 = vpop.eup %1121 }
 0x2b0   : > { %v750_v11 = vadd.f32 %v938_v8, %v741_v9  ;;  %v733_v12 = vmul.f32 %v1122_v10, %v719_v61 }
 0x2b2   : > { %752 = vst [vmem:[%s319_s25] sm:$0xff] %v750_v11  ;;  %v742_v13 = vmul.f32 %v937_v6, %v733_v12 }
 0x2b4   : > { %v751_v14 = vadd.f32 %v938_v8, %v742_v13 }
 0x2b6   : > { %753 = vst [vmem:[%s319_s25 + $0x8] sm:$0xff] %v751_v14 }
 0x2b7   : > { %1224 = shalt.err (!%p1221_p6)
}
 0x2b8   : > { %s1225_s7 = scalar_lea.hbm %s1569_s2, 256  ;;  %s1229_s15 = scalar_lea.hbm %s1625_s5, 512 }
 0x2b9   : > { %p1226_p12 = scmp.ne.s32.totalorder %s1569_s2, %s1225_s7  ;;  %p1230_p11 = scmp.lt.u32.totalorder %s1569_s2, %s1625_s5 }
 0x2ba   : > { %p1231_p0 = scmp.lt.u32.totalorder %s1229_s15, %s1225_s7  ;;  %p1233_p8 = scmp.lt.u32.totalorder %s1225_s7, %s1569_s2 }
 0x2bb   : > { %p1227_p10 = pnand %p1226_p12, %p1648_p13 }
 0x2bc   : > { %p1232_p5 = por %p1231_p0, %p1230_p11 }
 0x2bd   : > { %p1228_p9 = pneg %p1227_p10 }
 0x2be   : > { %p1234_p4 = por %p1233_p8, %p1232_p5 }
 0x2c0   : > { %p1235_p7 = pnand %p1234_p4, %p1228_p9 }
 0x2c2   : > { %1238 = shalt.err (!%p1235_p7)
}
 0x2c3   : > { %s1311_s16 = smov 128   ;;  %s1312_s6 = smov 8  }
 0x2c4   : > { %1004 = dma.vmem_to_hbm [thread:$0]  (%p1648_p13), %s1571_s0, 256, %s1569_s2, %s755_s22, %s1311_s16, %s1311_s16, %s1312_s6  }
 0x2c5 PF: > { %s783_s8 = sand.u32 1, %s1281_s18   ;;  %p1649_p1 = scmp.ne.s32.totalorder %s1640_s12, 0 }
 0x2c6   : > { %p1650_p3 = scmp.ge.s32.totalorder %s1301_s23, 2  ;;  %s784_s25 = scalar_lea.sflag [#allocation4], %s783_s8 }
 0x2c8   : > { %p1018_p2 = pnand %p1650_p3, %p1649_p1 }
 0x2ca   : > { %1276 = dma.done.wait (!%p1018_p2), %s784_s25, 256  }
 0x2cb   : > { %1278 = vsyncadd (!%p1018_p2), %s784_s25, 4294967040  ;;  %s22_s23 = sadd.s32 1, %s1301_s23   ;;  %s1651_s21 = sld [smem:[#allocation13_spill]] }
 0x2cc   : > { %p19_p6 = scmp.ge.s32.totalorder %s22_s23, 4   ;;  %s1652_s22 = sld [smem:[#allocation14_spill]] }
 0x2cd   : > { %s1653_s18 = smov %s1285_s19  ;;  %s1654_s19 = smov %s1289_s20 }
 0x2ce   : > { %s1655_s20 = smov %s1391_s30  ;;  %21 = sbr.rel (!%p19_p6) target bundleno = 10 (0xa), region = 109 }
 0x2d5   :  { %789 = vsyncpa [#allocation3], 1 }
 0x2d6   :  { %791 = vsyncpa [#allocation3 + $0x1], 1 }
 0x2d7   :  { %792 = vsyncpa [#allocation6], 1 }
 0x2d8   :  { %793 = vsyncpa [#allocation4], 1 }
 0x2d9   :  { %795 = vsyncpa [#allocation4 + $0x1], 1 }

</bundles_post_ra>
